<compile_context>
chip_gen: v7x
topology: tpu7x:2x2x1
jax: 0.10.0
libtpu: 0.0.40
codegen_flags: <defaults>
</compile_context>

<pallas_src>
import jax
import jax.numpy as jnp
from jax.experimental import pallas as pl
from jax.experimental.pallas import tpu as pltpu

SUBLANE = 8  # f32 sublane granularity


def _round_up(x, m):
    return ((x + m - 1) // m) * m


def mlp_kernel(x_ref, w1_ref, b1_ref, w2_ref, b2_ref, w3_ref, b3_ref, o_ref):
    # Layer 1: Linear(input_dim, 64) + ReLU  (f32 accumulation on the MXU)
    h1 = jnp.dot(x_ref[...], w1_ref[...], preferred_element_type=jnp.float32)
    h1 = jnp.maximum(h1 + b1_ref[...], 0.0)
    # Layer 2: Linear(64, 128) + ReLU
    h2 = jnp.dot(h1.astype(w2_ref.dtype), w2_ref[...],
                 preferred_element_type=jnp.float32)
    h2 = jnp.maximum(h2 + b2_ref[...], 0.0)
    # Layer 3: Linear(128, output_dim), no activation
    out = jnp.dot(h2.astype(w3_ref.dtype), w3_ref[...],
                  preferred_element_type=jnp.float32)
    o_ref[...] = (out + b3_ref[...]).astype(o_ref.dtype)


def net_forward(state, params, *, tile_b=1024, use_bf16=False):
    """Fused forward pass of Net.fc.  state: (B, input_dim) f32 -> (B, output_dim) f32."""
    w1, b1, w2, b2, w3, b3 = params
    B, in_dim = state.shape
    h1_dim = w1.shape[1]          # 64
    h2_dim = w2.shape[1]          # 128
    out_dim = w3.shape[1]

    # Batch tiling: multiple of the f32 sublane (8); aim for >= 2 grid steps
    # when the batch allows so v7x's two TensorCores both get work.
    tile_b = min(tile_b, _round_up(max(pl.cdiv(B, 2), 1), SUBLANE))
    tile_b = max(SUBLANE, _round_up(tile_b, SUBLANE))
    grid = (pl.cdiv(B, tile_b),)

    op_dtype = jnp.bfloat16 if use_bf16 else jnp.float32
    x = state.astype(op_dtype)
    w1c, w2c, w3c = (w.astype(op_dtype) for w in (w1, w2, w3))

    def const_spec(arr):
        # Whole array as one block, same block every grid step -> VMEM-resident.
        return pl.BlockSpec(arr.shape, lambda i: (0, 0))

    itemsize = jnp.dtype(op_dtype).itemsize
    flops = 2 * B * (in_dim * h1_dim + h1_dim * h2_dim + h2_dim * out_dim)
    bytes_accessed = (
        itemsize * (B * in_dim + in_dim * h1_dim + h1_dim * h2_dim + h2_dim * out_dim)
        + 4 * (h1_dim + h2_dim + out_dim + B * out_dim)
    )

    out = pl.pallas_call(
        mlp_kernel,
        out_shape=jax.ShapeDtypeStruct((B, out_dim), jnp.float32),
        grid=grid,
        in_specs=[
            pl.BlockSpec((tile_b, in_dim), lambda i: (i, 0)),
            const_spec(w1c), const_spec(b1),
            const_spec(w2c), const_spec(b2),
            const_spec(w3c), const_spec(b3),
        ],
        out_specs=pl.BlockSpec((tile_b, out_dim), lambda i: (i, 0)),
        compiler_params=pltpu.CompilerParams(
            dimension_semantics=("parallel",)),
        cost_estimate=pl.CostEstimate(
            flops=flops, transcendentals=0, bytes_accessed=bytes_accessed),
    )(x, w1c, b1, w2c, b2, w3c, b3)

    return out


def init_params(key, input_dim, output_dim):
    """Deterministic init matching nn.Linear's default U(-1/sqrt(fan_in), +1/sqrt(fan_in))."""
    dims = [(input_dim, 64), (64, 128), (128, output_dim)]
    params = []
    for (fan_in, fan_out) in dims:
        key, kw, kb = jax.random.split(key, 3)
        bound = 1.0 / jnp.sqrt(jnp.float32(fan_in))
        w = jax.random.uniform(kw, (fan_in, fan_out), jnp.float32, -bound, bound)
        b = jax.random.uniform(kb, (1, fan_out), jnp.float32, -bound, bound)
        params += [w, b]
    return tuple(params)


def reference_forward(state, params):
    w1, b1, w2, b2, w3, b3 = params
    h1 = jnp.maximum(state @ w1 + b1, 0.0)
    h2 = jnp.maximum(h1 @ w2 + b2, 0.0)
    return h2 @ w3 + b3


if __name__ == "__main__":
    key = jax.random.PRNGKey(0)
    key, k_state, k_state2 = jax.random.split(key, 3)

    input_dim = 16   # e.g. state-vector size for the dispatch problem
    output_dim = 8   # number of discrete actions

    params = init_params(key, input_dim, output_dim)

    # Small single-tile case (B=4): heuristic tile_b -> 8, grid of 1.
    state = jax.random.normal(k_state, (4, input_dim), jnp.float32)
    out = jax.block_until_ready(net_forward(state, params))
    ref = reference_forward(state, params)
    assert out.shape == (4, output_dim)
    assert jnp.allclose(out, ref, atol=1e-5, rtol=1e-5)

    # Multi-step grid with a partial final block (B=20 -> tile_b=16, grid of 2).
    state2 = jax.random.normal(k_state2, (20, input_dim), jnp.float32)
    out2 = jax.block_until_ready(net_forward(state2, params))
    ref2 = reference_forward(state2, params)
    assert out2.shape == (20, output_dim)
    assert jnp.allclose(out2, ref2, atol=1e-5, rtol=1e-5)

    # Optional bf16-operand fast path (looser tolerance; not exact parity).
    out3 = jax.block_until_ready(net_forward(state2, params, use_bf16=True))
    assert jnp.allclose(out3, ref2, atol=5e-2, rtol=5e-2)

    print("KERNEL_OK")
</pallas_src>

<mosaic_0001>
module attributes {stable_mosaic.version = 11 : i64} {
  func.func @mlp_kernel(%arg0: i32, %arg1: memref<8x16xf32, #tpu.memory_space<vmem>>, %arg2: memref<16x64xf32, #tpu.memory_space<vmem>>, %arg3: memref<1x64xf32, #tpu.memory_space<vmem>>, %arg4: memref<64x128xf32, #tpu.memory_space<vmem>>, %arg5: memref<1x128xf32, #tpu.memory_space<vmem>>, %arg6: memref<128x8xf32, #tpu.memory_space<vmem>>, %arg7: memref<1x8xf32, #tpu.memory_space<vmem>>, %arg8: memref<8x8xf32, #tpu.memory_space<vmem>>) attributes {dimension_semantics = [#tpu.dimension_semantics<parallel>], iteration_bounds = array<i64: 1>, scalar_prefetch = 0 : i64, scratch_operands = 0 : i64, tpu.core_type = #tpu.core_type<tc>, window_params = [{transform_indices = @transform_0, window_bounds = array<i64: 8, 16>}, {pipeline_mode = #tpu.pipeline_mode<synchronous>, transform_indices = @transform_1, window_bounds = array<i64: 16, 64>}, {pipeline_mode = #tpu.pipeline_mode<synchronous>, transform_indices = @transform_2, window_bounds = array<i64: 1, 64>}, {pipeline_mode = #tpu.pipeline_mode<synchronous>, transform_indices = @transform_3, window_bounds = array<i64: 64, 128>}, {pipeline_mode = #tpu.pipeline_mode<synchronous>, transform_indices = @transform_4, window_bounds = array<i64: 1, 128>}, {pipeline_mode = #tpu.pipeline_mode<synchronous>, transform_indices = @transform_5, window_bounds = array<i64: 128, 8>}, {pipeline_mode = #tpu.pipeline_mode<synchronous>, transform_indices = @transform_6, window_bounds = array<i64: 1, 8>}, {transform_indices = @transform_7, window_bounds = array<i64: 8, 8>}]} {
    %c0 = arith.constant 0 : index
    %c0_0 = arith.constant 0 : index
    %0 = vector.load %arg1[%c0, %c0_0] : memref<8x16xf32, #tpu.memory_space<vmem>>, vector<8x16xf32>
    %c0_1 = arith.constant 0 : index
    %c0_2 = arith.constant 0 : index
    %1 = vector.load %arg2[%c0_1, %c0_2] : memref<16x64xf32, #tpu.memory_space<vmem>>, vector<16x64xf32>
    %cst = arith.constant dense<0.000000e+00> : vector<8x64xf32>
    %2 = tpu.matmul %0, %1, %cst {dimension_numbers = #tpu.dot_dimension_numbers<[1], [0], [0], [1], [0, 0, 1, 1], [], []>} : vector<8x16xf32>, vector<16x64xf32>, vector<8x64xf32> -> vector<8x64xf32>
    %c0_3 = arith.constant 0 : index
    %c0_4 = arith.constant 0 : index
    %3 = vector.load %arg3[%c0_3, %c0_4] : memref<1x64xf32, #tpu.memory_space<vmem>>, vector<1x64xf32>
    %4 = vector.broadcast %3 : vector<1x64xf32> to vector<8x64xf32>
    %5 = arith.addf %2, %4 : vector<8x64xf32>
    %cst_5 = arith.constant 0.000000e+00 : f32
    %6 = vector.broadcast %cst_5 : f32 to vector<8x64xf32>
    %7 = arith.maximumf %5, %6 : vector<8x64xf32>
    %c0_6 = arith.constant 0 : index
    %c0_7 = arith.constant 0 : index
    %8 = vector.load %arg4[%c0_6, %c0_7] : memref<64x128xf32, #tpu.memory_space<vmem>>, vector<64x128xf32>
    %cst_8 = arith.constant dense<0.000000e+00> : vector<8x128xf32>
    %9 = tpu.matmul %7, %8, %cst_8 {dimension_numbers = #tpu.dot_dimension_numbers<[1], [0], [0], [1], [0, 0, 1, 1], [], []>} : vector<8x64xf32>, vector<64x128xf32>, vector<8x128xf32> -> vector<8x128xf32>
    %c0_9 = arith.constant 0 : index
    %c0_10 = arith.constant 0 : index
    %10 = vector.load %arg5[%c0_9, %c0_10] : memref<1x128xf32, #tpu.memory_space<vmem>>, vector<1x128xf32>
    %11 = vector.broadcast %10 : vector<1x128xf32> to vector<8x128xf32>
    %12 = arith.addf %9, %11 : vector<8x128xf32>
    %cst_11 = arith.constant 0.000000e+00 : f32
    %13 = vector.broadcast %cst_11 : f32 to vector<8x128xf32>
    %14 = arith.maximumf %12, %13 : vector<8x128xf32>
    %c0_12 = arith.constant 0 : index
    %c0_13 = arith.constant 0 : index
    %15 = vector.load %arg6[%c0_12, %c0_13] : memref<128x8xf32, #tpu.memory_space<vmem>>, vector<128x8xf32>
    %cst_14 = arith.constant dense<0.000000e+00> : vector<8x8xf32>
    %16 = tpu.matmul %14, %15, %cst_14 {dimension_numbers = #tpu.dot_dimension_numbers<[1], [0], [0], [1], [0, 0, 1, 1], [], []>} : vector<8x128xf32>, vector<128x8xf32>, vector<8x8xf32> -> vector<8x8xf32>
    %c0_15 = arith.constant 0 : index
    %c0_16 = arith.constant 0 : index
    %17 = vector.load %arg7[%c0_15, %c0_16] : memref<1x8xf32, #tpu.memory_space<vmem>>, vector<1x8xf32>
    %18 = vector.broadcast %17 : vector<1x8xf32> to vector<8x8xf32>
    %19 = arith.addf %16, %18 : vector<8x8xf32>
    %c0_17 = arith.constant 0 : index
    %c0_18 = arith.constant 0 : index
    %20 = vector.load %arg8[%c0_17, %c0_18] : memref<8x8xf32, #tpu.memory_space<vmem>>, vector<8x8xf32>
    tpu.vector_store %arg8[%c0_17, %c0_18], %19 {strides = array<i32>} : memref<8x8xf32, #tpu.memory_space<vmem>>, vector<8x8xf32>,
    return
  }
  func.func @transform_0(%arg0: i32) -> (i32, i32) {
    %c0_i32 = arith.constant 0 : i32
    %c0_i32_0 = arith.constant 0 : i32
    return %arg0, %c0_i32 : i32, i32
  }
  func.func @transform_1(%arg0: i32) -> (i32, i32) {
    %c0_i32 = arith.constant 0 : i32
    %c0_i32_0 = arith.constant 0 : i32
    %c0_i32_1 = arith.constant 0 : i32
    return %c0_i32, %c0_i32_0 : i32, i32
  }
  func.func @transform_2(%arg0: i32) -> (i32, i32) {
    %c0_i32 = arith.constant 0 : i32
    %c0_i32_0 = arith.constant 0 : i32
    %c0_i32_1 = arith.constant 0 : i32
    return %c0_i32, %c0_i32_0 : i32, i32
  }
  func.func @transform_3(%arg0: i32) -> (i32, i32) {
    %c0_i32 = arith.constant 0 : i32
    %c0_i32_0 = arith.constant 0 : i32
    %c0_i32_1 = arith.constant 0 : i32
    return %c0_i32, %c0_i32_0 : i32, i32
  }
  func.func @transform_4(%arg0: i32) -> (i32, i32) {
    %c0_i32 = arith.constant 0 : i32
    %c0_i32_0 = arith.constant 0 : i32
    %c0_i32_1 = arith.constant 0 : i32
    return %c0_i32, %c0_i32_0 : i32, i32
  }
  func.func @transform_5(%arg0: i32) -> (i32, i32) {
    %c0_i32 = arith.constant 0 : i32
    %c0_i32_0 = arith.constant 0 : i32
    %c0_i32_1 = arith.constant 0 : i32
    return %c0_i32, %c0_i32_0 : i32, i32
  }
  func.func @transform_6(%arg0: i32) -> (i32, i32) {
    %c0_i32 = arith.constant 0 : i32
    %c0_i32_0 = arith.constant 0 : i32
    %c0_i32_1 = arith.constant 0 : i32
    return %c0_i32, %c0_i32_0 : i32, i32
  }
  func.func @transform_7(%arg0: i32) -> (i32, i32) {
    %c0_i32 = arith.constant 0 : i32
    %c0_i32_0 = arith.constant 0 : i32
    return %arg0, %c0_i32 : i32, i32
  }
}

</mosaic_0001>

<bundles_post_ra>
// kernel: tpu_custom_call.1
= control target key start
LH: loop header
LB: loop body
LE: loop exit
PB: predicated region body
PF: predicated region fallthrough
CT: control target
= control target key end

     0   :  { %12 = vsyncpa [#allocation3], 0  ;;  %v477_v2 = vmov 0.0|0.0   ;;  %vm478_vm0 = vmmov 0   ;;  %v479_v6 = vmov 0.0   ;;  %vm37_vm1 = vcmask 130048   ;;  %s638_s0 = inlined_call_operand.vmem [shape: f32[4,16], index: 0, kind: input, shape index: {}]   ;;  %s639_s1 = inlined_call_operand.vmem [shape: f32[16,64], index: 1, kind: input, shape index: {}]   ;;  %s640_s2 = inlined_call_operand.vmem [shape: f32[1,64], index: 2, kind: input, shape index: {}]   ;;  %s641_s3 = inlined_call_operand.vmem [shape: f32[64,128], index: 3, kind: input, shape index: {}]   ;;  %s642_s4 = inlined_call_operand.vmem [shape: f32[1,128], index: 4, kind: input, shape index: {}]   ;;  %s643_s5 = inlined_call_operand.vmem [shape: f32[128,8], index: 5, kind: input, shape index: {}]   ;;  %s644_s6 = inlined_call_operand.vmem [shape: f32[1,8], index: 6, kind: input, shape index: {}]   ;;  %s645_s7 = inlined_call_operand.hbm [shape: f32[4,8], index: 7, kind: output, shape index: {}]  }
   0x1   :  { %v28_v0 = vld [vmem:[%s639_s1] sm:$0xff]  ;;  %v29_v1 = vld [vmem:[%s639_s1 + $0x8] sm:$0xff]  ;;  %408 = vmatprep.subr.bf16.mxu1 %v477_v2  ;;  %423 = vmatprep.subr.bf16.mxu0 %v477_v2  ;;  %v114_v9 = vld [vmem:[%s641_s3 + $0x10] sm:$0xff]  ;;  %vm127_vm2 = vcmask 523264   ;;  %vm295_vm3 = vcmask 64512  }
   0x2   :  { %v409_v3 = vpack.c.bf16 %v29_v1, %v28_v0  ;;  %v112_v4 = vld [vmem:[%s641_s3] sm:$0xff]  ;;  %v113_v5 = vld [vmem:[%s641_s3 + $0x8] sm:$0xff]  ;;  %351 = vmatprep.mubr.msk.f32.mxu1 %vm478_vm0, %v479_v6  ;;  %405 = vmatprep.mubr.msk.f32.mxu0 %vm478_vm0, %v479_v6  ;;  %v115_v10 = vld [vmem:[%s641_s3 + $0x18] sm:$0xff] }
   0x3   :  { %v27_v7 = vld [vmem:[%s638_s0] sm:$0xff]  ;;  %v412_v8 = vpack.c.bf16 %v113_v5, %v112_v4  ;;  %v415_v11 = vpack.c.bf16 %v115_v10, %v114_v9  ;;  %v117_v13 = vld [vmem:[%s641_s3 + $0x28] sm:$0xff]  ;;  %v118_v15 = vld [vmem:[%s641_s3 + $0x30] sm:$0xff] }
   0x4   :  { %410 = vmatpush3.bf16.msra.mxu1 %v409_v3  ;;  %v116_v12 = vld [vmem:[%s641_s3 + $0x20] sm:$0xff]  ;;  %v119_v16 = vld [vmem:[%s641_s3 + $0x38] sm:$0xff]  ;;  %v203_v19 = vld [vmem:[%s643_s5 + $0x8] sm:$0xff] }
   0x5   :  { %411 = vmatprep.subr.bf16.mxu1 %v477_v2  ;;  %v418_v14 = vpack.c.bf16 %v117_v13, %v116_v12  ;;  %v421_v17 = vpack.c.bf16 %v119_v16, %v118_v15  ;;  %v202_v18 = vld [vmem:[%s643_s5] sm:$0xff]  ;;  %v204_v20 = vld [vmem:[%s643_s5 + $0x10] sm:$0xff]  ;;  %v205_v22 = vld [vmem:[%s643_s5 + $0x18] sm:$0xff] }
   0x6   :  { %v424_v21 = vpack.c.bf16 %v203_v19, %v202_v18  ;;  %v427_v23 = vpack.c.bf16 %v205_v22, %v204_v20  ;;  %v206_v24 = vld [vmem:[%s643_s5 + $0x20] sm:$0xff]  ;;  %v207_v25 = vld [vmem:[%s643_s5 + $0x28] sm:$0xff]  ;;  %v208_v27 = vld [vmem:[%s643_s5 + $0x30] sm:$0xff] }
   0x7   :  { %352 = vmatmul.mubr.msk.f32.vlgmr.msra.gmra.mrb[0].mxu1 %vm37_vm1, %v27_v7  ;;  %v430_v26 = vpack.c.bf16 %v207_v25, %v206_v24  ;;  %v209_v28 = vld [vmem:[%s643_s5 + $0x38] sm:$0xff]  ;;  %v210_v30 = vld [vmem:[%s643_s5 + $0x40] sm:$0xff]  ;;  %v211_v31 = vld [vmem:[%s643_s5 + $0x48] sm:$0xff] }
   0x8   :  { %413 = vmatpush3.bf16.msra.mxu1 %v412_v8  ;;  %370 = vmatprep.mubr.msk.f32.mxu1 %vm478_vm0, %v479_v6  ;;  %v433_v29 = vpack.c.bf16 %v209_v28, %v208_v27  ;;  %v436_v32 = vpack.c.bf16 %v211_v31, %v210_v30  ;;  %v212_v33 = vld [vmem:[%s643_s5 + $0x50] sm:$0xff]  ;;  %v213_v34 = vld [vmem:[%s643_s5 + $0x58] sm:$0xff]  ;;  %v214_v36 = vld [vmem:[%s643_s5 + $0x60] sm:$0xff] }
   0x9   :  { %414 = vmatprep.subr.bf16.mxu1 %v477_v2  ;;  %425 = vmatpush3.bf16.msra.mxu0 %v424_v21  ;;  %v439_v35 = vpack.c.bf16 %v213_v34, %v212_v33  ;;  %v215_v37 = vld [vmem:[%s643_s5 + $0x68] sm:$0xff]  ;;  %v313_v39 = vld [vmem:[%s640_s2] ss:$0 sm:$0xff]  ;;  %v216_v44 = vld [vmem:[%s643_s5 + $0x70] sm:$0xff] }
   0xa   :  { %426 = vmatprep.subr.bf16.mxu0 %v477_v2  ;;  %v442_v38 = vpack.c.bf16 %v215_v37, %v214_v36  ;;  %v217_v45 = vld [vmem:[%s643_s5 + $0x78] sm:$0xff]  ;;  %v315_v47 = vld [vmem:[%s642_s4] ss:$0 sm:$0xff] }
   0xb   :  { %v445_v46 = vpack.c.bf16 %v217_v45, %v216_v44  ;;  %v317_v52 = vld [vmem:[%s644_s6] ss:$0 sm:$0xff] }
   0xc   :  { %416 = vmatpush3.bf16.msra.mxu1 %v415_v11 }
   0xd   :  { %417 = vmatprep.subr.bf16.mxu1 %v477_v2  ;;  %428 = vmatpush3.bf16.msra.mxu0 %v427_v23 }
   0xe   :  { %429 = vmatprep.subr.bf16.mxu0 %v477_v2 }
  0x10   :  { %419 = vmatpush3.bf16.msra.mxu1 %v418_v14 }
  0x11   :  { %420 = vmatprep.subr.bf16.mxu1 %v477_v2  ;;  %431 = vmatpush3.bf16.msra.mxu0 %v430_v26 }
  0x12   :  { %432 = vmatprep.subr.bf16.mxu0 %v477_v2 }
  0x14   :  { %422 = vmatpush3.bf16.msra.mxu1 %v421_v17 }
  0x15   :  { %434 = vmatpush3.bf16.msra.mxu0 %v433_v29 }
  0x16   :  { %435 = vmatprep.subr.bf16.mxu0 %v477_v2 }
  0x19   :  { %437 = vmatpush3.bf16.msra.mxu0 %v436_v32 }
  0x1a   :  { %438 = vmatprep.subr.bf16.mxu0 %v477_v2 }
  0x1d   :  { %440 = vmatpush3.bf16.msra.mxu0 %v439_v35 }
  0x1e   :  { %441 = vmatprep.subr.bf16.mxu0 %v477_v2 }
  0x21   :  { %443 = vmatpush3.bf16.msra.mxu0 %v442_v38 }
  0x22   :  { %444 = vmatprep.subr.bf16.mxu0 %v477_v2 }
  0x25   :  { %446 = vmatpush3.bf16.msra.mxu0 %v445_v46 }
  0xda   :  { %v107_v40 = vpop.f32.mrb[0].mxu1 }
  0xdb   :  { %v108_v41 = vadd.f32 %v313_v39, %v107_v40  ;;  %v353_v42 = vpop.f32.mrb[1].mxu1 }
  0xdd   :  { %v111_v43 = vmax.f32 %v108_v41, 0.0 }
  0xdf   :  { %371 = vmatmul.mubr.msk.f32.vlgmr.msra.gmra.mrb[2].mxu1 %vm127_vm2, %v111_v43 }
 0x1b2   :  { %v197_v48 = vpop.f32.mrb[2].mxu1 }
 0x1b3   :  { %v198_v49 = vadd.f32 %v315_v47, %v197_v48  ;;  %v372_v50 = vpop.f32.mrb[3].mxu1 }
 0x1b5   :  { %v201_v51 = vmax.f32 %v198_v49, 0.0 }
 0x1b7   :  { %406 = vmatmul.mubr.f32.vlgmr.msra.gmra.mrb[0].mxu0 %v201_v51 }
 0x28a   :  { %v291_v53 = vpop.f32.mrb[0].mxu0 }
 0x28b   :  { %v292_v54 = vadd.f32 %v317_v52, %v291_v53  ;;  %v407_v55 = vpop.f32.mrb[1].mxu0 }
 0x28d   :  { %296 = vst.msk [vmem:[#allocation2] sm:$0xff] %vm295_vm3, %v292_v54 }
 0x28e   :  { %301 = vsyncadd [#allocation3], 64  ;;  %s480_s5 = smov [#allocation2]  }
 0x28f   :  { %s302_s8 = sshll.u32 %s480_s5, 4  ;;  %s303_s8 = int_to_ptr.vmem [resolvable:$true] %s302_s8 }
 0x290   :  { %s453_s1 = scalar_lea.vmem %s303_s8, 64  ;;  %s457_s4 = scalar_lea.vmem %s303_s8, 128 }
 0x291   :  { %p454_p0 = scmp.ne.s32.totalorder %s303_s8, %s453_s1  ;;  %p458_p1 = scmp.lt.s32.totalorder %s303_s8, %s303_s8 }
 0x292   :  { %p459_p2 = scmp.lt.s32.totalorder %s457_s4, %s453_s1 }
 0x294   :  { %p460_p3 = por %p459_p2, %p458_p1 }
 0x296   :  { %p461_p4 = pnand %p460_p3, %p454_p0 }
 0x298   :  { %464 = shalt.err (!%p461_p4)
}
 0x299   :  { %s465_s6 = scalar_lea.hbm %s645_s7, 64 }
 0x29a   :  { %p466_p5 = scmp.ne.s32.totalorder %s645_s7, %s465_s6  ;;  %p469_p6 = scmp.lt.u32.totalorder %s465_s6, %s645_s7 }
 0x29c   :  { %p471_p7 = pnand %p469_p6, %p466_p5 }
 0x29e   :  { %474 = shalt.err (!%p471_p7)
}
 0x29f   :  { %s481_s0 = smov 64   ;;  %s482_s15 = smov 4  }
 0x2a0   :  { %308 = dma.vmem_to_hbm [thread:$0]  %s303_s8, 64, %s645_s7, [#allocation3], %s481_s0, %s481_s0, %s482_s15  }
 0x2a1   :  { %475 = dma.done.wait [#allocation3], 128  }
 0x2a2   :  { %476 = vsyncadd [#allocation3], 4294967168 }
 0x2a3   :  { %312 = vsyncpa [#allocation3], 1 }

</bundles_post_ra>
